<compile_context>
chip_gen: v5e
topology: v5e:2x2
jax: 0.10.0
libtpu: 0.0.40
codegen_flags: <defaults>
</compile_context>

<pallas_src>
import jax
import jax.numpy as jnp
from jax.experimental import pallas as pl
from jax.experimental.pallas import tpu as pltpu

_HIDDEN = 64
_HP = 128          # hidden width padded to one full 128-lane vreg / MXU tile


def _round_up(x, m):
    return (x + m - 1) // m * m


def init_actor_params(key, state_dim, action_dim):
    """Deterministic synthetic init (uniform, like PyTorch default fan-in bound)."""
    ks = jax.random.split(key, 6)

    def linear(kw, kb, fan_in, fan_out):
        bound = 1.0 / jnp.sqrt(fan_in)
        w = jax.random.uniform(kw, (fan_in, fan_out), jnp.float32, -bound, bound)
        b = jax.random.uniform(kb, (1, fan_out), jnp.float32, -bound, bound)
        return w, b

    w1, b1 = linear(ks[0], ks[1], state_dim, _HIDDEN)
    w2, b2 = linear(ks[2], ks[3], _HIDDEN, _HIDDEN)
    w3, b3 = linear(ks[4], ks[5], _HIDDEN, action_dim)
    return dict(w1=w1, b1=b1, w2=w2, b2=b2, w3=w3, b3=b3)


def prepare_actor_params(params, compute_dtype=jnp.bfloat16):
    """One-time pre-pad + cast of the actor weights. Store the result in the actor
    state and reuse it; do NOT call this per forward pass.

    Hidden width is zero-padded to 128 lanes (full MXU tiles, no relayout), weights
    are cast to the matmul operand dtype (bf16 by default), biases stay f32 so the
    bias-add / relu / tanh epilogue runs in f32 on every TPU generation. The action
    width is left unpadded so the output writeback is not lane-inflated.
    Zero padding keeps the real lanes numerically identical to the unpadded math.
    """
    S = params["w1"].shape[0]
    A = params["w3"].shape[1]
    cd = compute_dtype
    w1 = jnp.zeros((S, _HP), cd).at[:, :_HIDDEN].set(params["w1"].astype(cd))
    w2 = jnp.zeros((_HP, _HP), cd).at[:_HIDDEN, :_HIDDEN].set(params["w2"].astype(cd))
    w3 = jnp.zeros((_HP, A), cd).at[:_HIDDEN, :].set(params["w3"].astype(cd))
    b1 = jnp.zeros((1, _HP), jnp.float32).at[:, :_HIDDEN].set(params["b1"].astype(jnp.float32))
    b2 = jnp.zeros((1, _HP), jnp.float32).at[:, :_HIDDEN].set(params["b2"].astype(jnp.float32))
    b3 = params["b3"].astype(jnp.float32)
    return dict(w1=w1, b1=b1, w2=w2, b2=b2, w3=w3, b3=b3)


def _actor_kernel(ma_ref, x_ref, w1_ref, b1_ref, w2_ref, b2_ref, w3_ref, b3_ref,
                  out_ref):
    max_action = ma_ref[0]
    op_dtype = w1_ref.dtype
    # Layer 1: (TB, S) @ (S, 128) -> f32 accumulate, f32 bias+relu epilogue.
    h = jnp.dot(x_ref[...], w1_ref[...], preferred_element_type=jnp.float32)
    h = jnp.maximum(h + b1_ref[...], 0.0)
    # Layer 2: (TB, 128) @ (128, 128)
    h = jnp.dot(h.astype(op_dtype), w2_ref[...], preferred_element_type=jnp.float32)
    h = jnp.maximum(h + b2_ref[...], 0.0)
    # Layer 3: (TB, 128) @ (128, A) -> max_action * tanh in f32, lane-narrow store.
    h = jnp.dot(h.astype(op_dtype), w3_ref[...], preferred_element_type=jnp.float32)
    out_ref[...] = (max_action * jnp.tanh(h + b3_ref[...])).astype(out_ref.dtype)


def actor_forward(state, padded_params, max_action, *, block_b=512):
    """state: (B, state_dim). padded_params: output of prepare_actor_params().
    Call under jax.jit so the (rare) batch pad / cast fuses with the custom call."""
    B, S = state.shape
    p = padded_params
    A = p["w3"].shape[1]
    op_dtype = p["w1"].dtype

    # Pick the tile COUNT first, then the tile size (multiple of 8 sublanes): batch
    # padding waste is bounded by <8 rows per tile. Force >=2 grid steps for
    # non-trivial batches so ("parallel",) gives both v7x TensorCores work
    # (harmless on single-TC v5e/v6e).
    ntiles = pl.cdiv(B, block_b)
    if B >= 16:
        ntiles = max(ntiles, 2)
    tb = _round_up(pl.cdiv(B, ntiles), 8)
    b_pad = ntiles * tb

    x = state.astype(op_dtype)
    if b_pad != B:
        x = jnp.zeros((b_pad, S), op_dtype).at[:B].set(x)

    ma = jnp.asarray([max_action], jnp.float32)

    op_bytes = jnp.dtype(op_dtype).itemsize
    cost = pl.CostEstimate(
        flops=int(2 * b_pad * (S * _HP + _HP * _HP + _HP * A)),
        transcendentals=int(b_pad * A),
        bytes_accessed=int(op_bytes * (b_pad * S + S * _HP + _HP * _HP + _HP * A)
                           + 4 * (2 * _HP + A) + 4 * b_pad * A),
    )

    out = pl.pallas_call(
        _actor_kernel,
        out_shape=jax.ShapeDtypeStruct((b_pad, A), jnp.float32),
        grid=(ntiles,),
        in_specs=[
            pl.BlockSpec(memory_space=pltpu.MemorySpace.SMEM),   # max_action scalar
            pl.BlockSpec((tb, S), lambda i: (i, 0)),             # state tile (pipelined)
            # Weights/biases: constant index_map -> DMA'd once, VMEM-resident across
            # all batch tiles. (pl.Buffered(1) would drop the dead second buffer, but
            # VMEM is ~100x from binding here, so we keep the default.)
            pl.BlockSpec((S, _HP), lambda i: (0, 0)),
            pl.BlockSpec((1, _HP), lambda i: (0, 0)),
            pl.BlockSpec((_HP, _HP), lambda i: (0, 0)),
            pl.BlockSpec((1, _HP), lambda i: (0, 0)),
            pl.BlockSpec((_HP, A), lambda i: (0, 0)),
            pl.BlockSpec((1, A), lambda i: (0, 0)),
        ],
        out_specs=pl.BlockSpec((tb, A), lambda i: (i, 0)),       # lane-narrow writeback
        compiler_params=pltpu.CompilerParams(
            dimension_semantics=("parallel",)),                  # 2 TCs on v7x
        cost_estimate=cost,
    )(ma, x, p["w1"], p["b1"], p["w2"], p["b2"], p["w3"], p["b3"])

    if b_pad != B:
        out = out[:B]
    return out


def actor_ref(state, params, max_action):
    h = jnp.maximum(state @ params["w1"] + params["b1"], 0.0)
    h = jnp.maximum(h @ params["w2"] + params["b2"], 0.0)
    return max_action * jnp.tanh(h @ params["w3"] + params["b3"])


if __name__ == "__main__":
    key = jax.random.PRNGKey(0)
    k_param, k_state, k_big = jax.random.split(key, 3)

    batch = 8
    state_dim = 12
    action_dim = 4
    max_action = 2.0

    params = init_actor_params(k_param, state_dim, action_dim)
    fwd = jax.jit(actor_forward, static_argnames=("block_b",))

    # Exactness check: f32 operands, single-tile grid=(1,) — must match the f32
    # reference to fp rounding.
    params_f32 = prepare_actor_params(params, compute_dtype=jnp.float32)
    state = jax.random.normal(k_state, (batch, state_dim), jnp.float32)
    action = jax.block_until_ready(fwd(state, params_f32, max_action))
    expected = actor_ref(state, params, max_action)
    assert action.shape == (batch, action_dim)
    assert jnp.allclose(action, expected, atol=1e-5, rtol=1e-5), "mismatch (f32, small batch)"

    # Production path: bf16 operands, multi-tile grid, non-multiple batch
    # (exercises tile-count heuristic, row padding, masked lane-narrow stores).
    params_bf16 = prepare_actor_params(params, compute_dtype=jnp.bfloat16)
    big_batch = 300
    state_big = jax.random.normal(k_big, (big_batch, state_dim), jnp.float32)
    action_big = jax.block_until_ready(fwd(state_big, params_bf16, max_action))
    expected_big = actor_ref(state_big, params, max_action)
    assert action_big.shape == (big_batch, action_dim)
    max_err = float(jnp.max(jnp.abs(action_big - expected_big)))
    assert max_err < 5e-2, f"mismatch (bf16, big batch): max abs err {max_err}"

    print("KERNEL_OK")
</pallas_src>

<mosaic_0001>
module attributes {stable_mosaic.version = 11 : i64} {
  func.func @_actor_kernel(%arg0: i32, %arg1: memref<1xf32, #tpu.memory_space<smem>>, %arg2: memref<8x12xf32, #tpu.memory_space<vmem>>, %arg3: memref<12x128xf32, #tpu.memory_space<vmem>>, %arg4: memref<1x128xf32, #tpu.memory_space<vmem>>, %arg5: memref<128x128xf32, #tpu.memory_space<vmem>>, %arg6: memref<1x128xf32, #tpu.memory_space<vmem>>, %arg7: memref<128x4xf32, #tpu.memory_space<vmem>>, %arg8: memref<1x4xf32, #tpu.memory_space<vmem>>, %arg9: memref<8x4xf32, #tpu.memory_space<vmem>>) attributes {dimension_semantics = [#tpu.dimension_semantics<parallel>], iteration_bounds = array<i64: 1>, scalar_prefetch = 0 : i64, scratch_operands = 0 : i64, tpu.core_type = #tpu.core_type<tc>, window_params = [{transform_indices = @transform_0, window_bounds = array<i64: 1>}, {transform_indices = @transform_1, window_bounds = array<i64: 8, 12>}, {pipeline_mode = #tpu.pipeline_mode<synchronous>, transform_indices = @transform_2, window_bounds = array<i64: 12, 128>}, {pipeline_mode = #tpu.pipeline_mode<synchronous>, transform_indices = @transform_3, window_bounds = array<i64: 1, 128>}, {pipeline_mode = #tpu.pipeline_mode<synchronous>, transform_indices = @transform_4, window_bounds = array<i64: 128, 128>}, {pipeline_mode = #tpu.pipeline_mode<synchronous>, transform_indices = @transform_5, window_bounds = array<i64: 1, 128>}, {pipeline_mode = #tpu.pipeline_mode<synchronous>, transform_indices = @transform_6, window_bounds = array<i64: 128, 4>}, {pipeline_mode = #tpu.pipeline_mode<synchronous>, transform_indices = @transform_7, window_bounds = array<i64: 1, 4>}, {transform_indices = @transform_8, window_bounds = array<i64: 8, 4>}]} {
    %c0 = arith.constant 0 : index
    %0 = memref.load %arg1[%c0] : memref<1xf32, #tpu.memory_space<smem>>
    %c0_0 = arith.constant 0 : index
    %c0_1 = arith.constant 0 : index
    %1 = vector.load %arg2[%c0_0, %c0_1] : memref<8x12xf32, #tpu.memory_space<vmem>>, vector<8x12xf32>
    %c0_2 = arith.constant 0 : index
    %c0_3 = arith.constant 0 : index
    %2 = vector.load %arg3[%c0_2, %c0_3] : memref<12x128xf32, #tpu.memory_space<vmem>>, vector<12x128xf32>
    %cst = arith.constant dense<0.000000e+00> : vector<8x128xf32>
    %3 = tpu.matmul %1, %2, %cst {dimension_numbers = #tpu.dot_dimension_numbers<[1], [0], [0], [1], [0, 0, 1, 1], [], []>} : vector<8x12xf32>, vector<12x128xf32>, vector<8x128xf32> -> vector<8x128xf32>
    %c0_4 = arith.constant 0 : index
    %c0_5 = arith.constant 0 : index
    %4 = vector.load %arg4[%c0_4, %c0_5] : memref<1x128xf32, #tpu.memory_space<vmem>>, vector<1x128xf32>
    %5 = vector.broadcast %4 : vector<1x128xf32> to vector<8x128xf32>
    %6 = arith.addf %3, %5 : vector<8x128xf32>
    %cst_6 = arith.constant 0.000000e+00 : f32
    %7 = vector.broadcast %cst_6 : f32 to vector<8x128xf32>
    %8 = arith.maximumf %6, %7 : vector<8x128xf32>
    %c0_7 = arith.constant 0 : index
    %c0_8 = arith.constant 0 : index
    %9 = vector.load %arg5[%c0_7, %c0_8] : memref<128x128xf32, #tpu.memory_space<vmem>>, vector<128x128xf32>
    %cst_9 = arith.constant dense<0.000000e+00> : vector<8x128xf32>
    %10 = tpu.matmul %8, %9, %cst_9 {dimension_numbers = #tpu.dot_dimension_numbers<[1], [0], [0], [1], [0, 0, 1, 1], [], []>} : vector<8x128xf32>, vector<128x128xf32>, vector<8x128xf32> -> vector<8x128xf32>
    %c0_10 = arith.constant 0 : index
    %c0_11 = arith.constant 0 : index
    %11 = vector.load %arg6[%c0_10, %c0_11] : memref<1x128xf32, #tpu.memory_space<vmem>>, vector<1x128xf32>
    %12 = vector.broadcast %11 : vector<1x128xf32> to vector<8x128xf32>
    %13 = arith.addf %10, %12 : vector<8x128xf32>
    %cst_12 = arith.constant 0.000000e+00 : f32
    %14 = vector.broadcast %cst_12 : f32 to vector<8x128xf32>
    %15 = arith.maximumf %13, %14 : vector<8x128xf32>
    %c0_13 = arith.constant 0 : index
    %c0_14 = arith.constant 0 : index
    %16 = vector.load %arg7[%c0_13, %c0_14] : memref<128x4xf32, #tpu.memory_space<vmem>>, vector<128x4xf32>
    %cst_15 = arith.constant dense<0.000000e+00> : vector<8x4xf32>
    %17 = tpu.matmul %15, %16, %cst_15 {dimension_numbers = #tpu.dot_dimension_numbers<[1], [0], [0], [1], [0, 0, 1, 1], [], []>} : vector<8x128xf32>, vector<128x4xf32>, vector<8x4xf32> -> vector<8x4xf32>
    %c0_16 = arith.constant 0 : index
    %c0_17 = arith.constant 0 : index
    %18 = vector.load %arg8[%c0_16, %c0_17] : memref<1x4xf32, #tpu.memory_space<vmem>>, vector<1x4xf32>
    %19 = vector.broadcast %18 : vector<1x4xf32> to vector<8x4xf32>
    %20 = arith.addf %17, %19 : vector<8x4xf32>
    %21 = math.tanh %20 : vector<8x4xf32>
    %22 = vector.broadcast %0 : f32 to vector<8x4xf32>
    %23 = arith.mulf %22, %21 : vector<8x4xf32>
    %c0_18 = arith.constant 0 : index
    %c0_19 = arith.constant 0 : index
    %24 = vector.load %arg9[%c0_18, %c0_19] : memref<8x4xf32, #tpu.memory_space<vmem>>, vector<8x4xf32>
    tpu.vector_store %arg9[%c0_18, %c0_19], %23 {strides = array<i32>} : memref<8x4xf32, #tpu.memory_space<vmem>>, vector<8x4xf32>,
    return
  }
  func.func @transform_0(%arg0: i32) -> i32 {
    %c0_i32 = arith.constant 0 : i32
    %c0_i32_0 = arith.constant 0 : i32
    return %c0_i32 : i32
  }
  func.func @transform_1(%arg0: i32) -> (i32, i32) {
    %c0_i32 = arith.constant 0 : i32
    %c0_i32_0 = arith.constant 0 : i32
    return %arg0, %c0_i32 : i32, i32
  }
  func.func @transform_2(%arg0: i32) -> (i32, i32) {
    %c0_i32 = arith.constant 0 : i32
    %c0_i32_0 = arith.constant 0 : i32
    %c0_i32_1 = arith.constant 0 : i32
    return %c0_i32, %c0_i32_0 : i32, i32
  }
  func.func @transform_3(%arg0: i32) -> (i32, i32) {
    %c0_i32 = arith.constant 0 : i32
    %c0_i32_0 = arith.constant 0 : i32
    %c0_i32_1 = arith.constant 0 : i32
    return %c0_i32, %c0_i32_0 : i32, i32
  }
  func.func @transform_4(%arg0: i32) -> (i32, i32) {
    %c0_i32 = arith.constant 0 : i32
    %c0_i32_0 = arith.constant 0 : i32
    %c0_i32_1 = arith.constant 0 : i32
    return %c0_i32, %c0_i32_0 : i32, i32
  }
  func.func @transform_5(%arg0: i32) -> (i32, i32) {
    %c0_i32 = arith.constant 0 : i32
    %c0_i32_0 = arith.constant 0 : i32
    %c0_i32_1 = arith.constant 0 : i32
    return %c0_i32, %c0_i32_0 : i32, i32
  }
  func.func @transform_6(%arg0: i32) -> (i32, i32) {
    %c0_i32 = arith.constant 0 : i32
    %c0_i32_0 = arith.constant 0 : i32
    %c0_i32_1 = arith.constant 0 : i32
    return %c0_i32, %c0_i32_0 : i32, i32
  }
  func.func @transform_7(%arg0: i32) -> (i32, i32) {
    %c0_i32 = arith.constant 0 : i32
    %c0_i32_0 = arith.constant 0 : i32
    %c0_i32_1 = arith.constant 0 : i32
    return %c0_i32, %c0_i32_0 : i32, i32
  }
  func.func @transform_8(%arg0: i32) -> (i32, i32) {
    %c0_i32 = arith.constant 0 : i32
    %c0_i32_0 = arith.constant 0 : i32
    return %arg0, %c0_i32 : i32, i32
  }
}

</mosaic_0001>

<bundles_post_ra>
// kernel: actor_forward.1
= control target key start
LH: loop header
LB: loop body
LE: loop exit
PB: predicated region body
PF: predicated region fallthrough
CT: control target
= control target key end

     0   :  { %14 = vsyncpa [#allocation4], 0  ;;  %s500_s0 = inlined_call_operand.<no memory space> [shape: f32[1], index: 0, kind: input, shape index: {}]   ;;  %s501_s1 = inlined_call_operand.vmem [shape: f32[8,12], index: 1, kind: input, shape index: {}]   ;;  %s502_s2 = inlined_call_operand.hbm [shape: f32[12,128], index: 2, kind: input, shape index: {}]   ;;  %s503_s3 = inlined_call_operand.hbm [shape: f32[1,128], index: 3, kind: input, shape index: {}]   ;;  %s504_s4 = inlined_call_operand.vmem [shape: f32[128,128], index: 4, kind: input, shape index: {}]   ;;  %s505_s5 = inlined_call_operand.hbm [shape: f32[1,128], index: 5, kind: input, shape index: {}]   ;;  %s506_s6 = inlined_call_operand.vmem [shape: f32[128,4], index: 6, kind: input, shape index: {}]   ;;  %s507_s7 = inlined_call_operand.hbm [shape: f32[1,4], index: 7, kind: input, shape index: {}]   ;;  %s508_s8 = inlined_call_operand.vmem [shape: f32[8,4], index: 8, kind: output, shape index: {}]  }
   0x1   :  { %15 = vsyncpa [#allocation6], 0  ;;  %s39_s29 = sshll.u32 %s503_s3, 4  ;;  %s40_s29 = int_to_ptr.hbm [resolvable:$true] %s39_s29 }
   0x2   :  { %16 = vsyncpa [#allocation9], 0  ;;  %s332_s30 = smov [#allocation5]   ;;  %s25_s12 = sshll.u32 %s502_s2, 4  ;;  %s26_s12 = int_to_ptr.hbm [resolvable:$true] %s25_s12 }
   0x3   :  { %s41_s9 = sshll.u32 %s332_s30, 4  ;;  %s333_s13 = smov [#allocation3]   ;;  %s42_s9 = int_to_ptr.vmem [resolvable:$true] %s41_s9 }
   0x4   :  { %44 = dma.hbm_to_vmem [thread:$0]  %s40_s29, 16, %s42_s9, [#allocation6]  }
   0x5   :  { %s27_s14 = sshll.u32 %s333_s13, 4  ;;  %s334_s15 = smov 128   ;;  %s28_s14 = int_to_ptr.vmem [resolvable:$true] %s27_s14 }
   0x6   :  { %s335_s16 = smov 8   ;;  %s52_s3 = sshll.u32 %s505_s5, 4  ;;  %s53_s3 = int_to_ptr.hbm [resolvable:$true] %s52_s3 }
   0x7   :  { %33 = dma.hbm_to_vmem [thread:$0]  %s26_s12, 256, %s28_s14, [#allocation4], %s334_s15, %s334_s15, %s335_s16  }
   0x8   :  { %s336_s19 = smov [#allocation7]   ;;  %s65_s2 = sshll.u32 %s507_s7, 4  ;;  %s66_s2 = int_to_ptr.hbm [resolvable:$true] %s65_s2 }
   0x9   :  { %s54_s20 = sshll.u32 %s336_s19, 4  ;;  %s337_s23 = smov [#allocation8]   ;;  %s55_s20 = int_to_ptr.vmem [resolvable:$true] %s54_s20 }
   0xa   :  { %57 = dma.hbm_to_vmem [thread:$0]  %s53_s3, 16, %s55_s20, [#allocation6]  }
   0xb   :  { %s67_s24 = sshll.u32 %s337_s23, 4  ;;  %s68_s24 = int_to_ptr.vmem [resolvable:$true] %s67_s24 }
   0xc   :  { %70 = dma.hbm_to_vmem [thread:$0]  %s66_s2, 16, %s68_s24, [#allocation9]  }
   0xd   :  { %326 = dma.done.wait [#allocation4], 256  }
   0xe   :  { %327 = vsyncadd [#allocation4], 4294967040 }
   0xf   :  { %328 = dma.done.wait [#allocation6], 32  }
  0x10   :  { %329 = vsyncadd [#allocation6], 4294967264 }
  0x11   :  { %330 = dma.done.wait [#allocation9], 16  }
  0x12   :  { %331 = vsyncadd [#allocation9], 4294967280  ;;  %vm99_vm0 = vcmask 1043456   ;;  %v90_v0 = vld [vmem:[#allocation3 + $0x8] sm:$0xf]  ;;  %v89_v1 = vld [vmem:[#allocation3] sm:$0xff]  ;;  %v206_v46 = vstv %s500_s0 }
  0x13   :  { %217 = vmatpush.msk.msra.mxu0 %vm99_vm0, %v90_v0  ;;  %v88_v2 = vld [vmem:[%s501_s1] sm:$0xff]  ;;  %vm95_vm1 = vcmask 97280   ;;  %v139_v3 = vld [vmem:[%s504_s4 + $0x78] sm:$0xff]  ;;  %v138_v4 = vld [vmem:[%s504_s4 + $0x70] sm:$0xff]  ;;  %vm208_vm2 = vcmask 31744  }
  0x14   :  { %144 = vmatpush.msra.mxu1 %v139_v3  ;;  %v137_v5 = vld [vmem:[%s504_s4 + $0x68] sm:$0xff]  ;;  %v136_v6 = vld [vmem:[%s504_s4 + $0x60] sm:$0xff]  ;;  %v135_v7 = vld [vmem:[%s504_s4 + $0x58] sm:$0xff] }
  0x15   :  { %118 = vmatpush.msra.mxu0 %v89_v1  ;;  %v134_v8 = vld [vmem:[%s504_s4 + $0x50] sm:$0xff]  ;;  %v133_v9 = vld [vmem:[%s504_s4 + $0x48] sm:$0xff]  ;;  %v132_v10 = vld [vmem:[%s504_s4 + $0x40] sm:$0xff] }
  0x16   :  { %218 = vmatmul.msk.f32.vlgmr.msra.gmra.mxu0 %vm95_vm1, %v88_v2  ;;  %145 = vmatpush.msra.mxu1 %v138_v4  ;;  %v131_v11 = vld [vmem:[%s504_s4 + $0x38] sm:$0xff]  ;;  %v130_v12 = vld [vmem:[%s504_s4 + $0x30] sm:$0xff]  ;;  %v129_v13 = vld [vmem:[%s504_s4 + $0x28] sm:$0xff] }
  0x17   :  { %v128_v14 = vld [vmem:[%s504_s4 + $0x20] sm:$0xff]  ;;  %v127_v15 = vld [vmem:[%s504_s4 + $0x18] sm:$0xff]  ;;  %v126_v16 = vld [vmem:[%s504_s4 + $0x10] sm:$0xff] }
  0x18   :  { %146 = vmatpush.msra.mxu1 %v137_v5  ;;  %v125_v17 = vld [vmem:[%s504_s4 + $0x8] sm:$0xff]  ;;  %v124_v18 = vld [vmem:[%s504_s4] sm:$0xff]  ;;  %v180_v19 = vld [vmem:[%s506_s6 + $0x78] sm:$0xff] }
  0x19   :  { %v179_v20 = vld [vmem:[%s506_s6 + $0x70] sm:$0xff]  ;;  %185 = vmatpush.msra.mxu2 %v180_v19  ;;  %v178_v21 = vld [vmem:[%s506_s6 + $0x68] sm:$0xff]  ;;  %v177_v22 = vld [vmem:[%s506_s6 + $0x60] sm:$0xff] }
  0x1a   :  { %147 = vmatpush.msra.mxu1 %v136_v6  ;;  %v176_v23 = vld [vmem:[%s506_s6 + $0x58] sm:$0xff]  ;;  %v175_v24 = vld [vmem:[%s506_s6 + $0x50] sm:$0xff]  ;;  %v174_v25 = vld [vmem:[%s506_s6 + $0x48] sm:$0xff] }
  0x1b   :  { %186 = vmatpush.msra.mxu2 %v179_v20  ;;  %v173_v26 = vld [vmem:[%s506_s6 + $0x40] sm:$0xff]  ;;  %v172_v27 = vld [vmem:[%s506_s6 + $0x38] sm:$0xff]  ;;  %v171_v28 = vld [vmem:[%s506_s6 + $0x30] sm:$0xff] }
  0x1c   :  { %148 = vmatpush.msra.mxu1 %v135_v7  ;;  %v170_v29 = vld [vmem:[%s506_s6 + $0x28] sm:$0xff]  ;;  %v169_v30 = vld [vmem:[%s506_s6 + $0x20] sm:$0xff]  ;;  %v168_v31 = vld [vmem:[%s506_s6 + $0x18] sm:$0xff] }
  0x1d   :  { %187 = vmatpush.msra.mxu2 %v178_v21  ;;  %v225_v32 = vld [vmem:[#allocation5] ss:$0 sm:$0xff]  ;;  %v166_v37 = vld [vmem:[%s506_s6 + $0x8] sm:$0xff]  ;;  %v165_v38 = vld [vmem:[%s506_s6] sm:$0xff] }
  0x1e   :  { %149 = vmatpush.msra.mxu1 %v134_v8  ;;  %v167_v36 = vld [vmem:[%s506_s6 + $0x10] sm:$0xff] }
  0x1f   :  { %188 = vmatpush.msra.mxu2 %v177_v22  ;;  %v226_v39 = vld [vmem:[#allocation7] ss:$0 sm:$0xff]  ;;  %v227_v43 = vld [vmem:[#allocation8] ss:$0 sm:$0xff] }
  0x20   :  { %150 = vmatpush.msra.mxu1 %v133_v9 }
  0x21   :  { %189 = vmatpush.msra.mxu2 %v176_v23 }
  0x22   :  { %151 = vmatpush.msra.mxu1 %v132_v10 }
  0x23   :  { %190 = vmatpush.msra.mxu2 %v175_v24 }
  0x24   :  { %152 = vmatpush.msra.mxu1 %v131_v11 }
  0x25   :  { %191 = vmatpush.msra.mxu2 %v174_v25 }
  0x26   :  { %153 = vmatpush.msra.mxu1 %v130_v12 }
  0x27   :  { %192 = vmatpush.msra.mxu2 %v173_v26 }
  0x28   :  { %154 = vmatpush.msra.mxu1 %v129_v13 }
  0x29   :  { %193 = vmatpush.msra.mxu2 %v172_v27 }
  0x2a   :  { %155 = vmatpush.msra.mxu1 %v128_v14 }
  0x2b   :  { %194 = vmatpush.msra.mxu2 %v171_v28 }
  0x2c   :  { %156 = vmatpush.msra.mxu1 %v127_v15 }
  0x2d   :  { %195 = vmatpush.msra.mxu2 %v170_v29 }
  0x2e   :  { %157 = vmatpush.msra.mxu1 %v126_v16 }
  0x2f   :  { %196 = vmatpush.msra.mxu2 %v169_v30 }
  0x30   :  { %158 = vmatpush.msra.mxu1 %v125_v17 }
  0x31   :  { %197 = vmatpush.msra.mxu2 %v168_v31 }
  0x32   :  { %159 = vmatpush.msra.mxu1 %v124_v18 }
  0x33   :  { %198 = vmatpush.msra.mxu2 %v167_v36 }
  0x35   :  { %199 = vmatpush.msra.mxu2 %v166_v37 }
  0x37   :  { %200 = vmatpush.msra.mxu2 %v165_v38 }
  0x93   :  { %v120_v33 = vpop.f32.mrf.mxu0 }
  0x94   :  { %v121_v34 = vadd.f32 %v225_v32, %v120_v33 }
  0x96   :  { %v123_v35 = vmax.f32 %v121_v34, 0.0 }
  0x98   :  { %160 = vmatmul.f32.vlgmr.msra.gmra.mxu1 %v123_v35 }
 0x115   :  { %v161_v40 = vpop.f32.mrf.mxu1 }
 0x116   :  { %v162_v41 = vadd.f32 %v226_v39, %v161_v40 }
 0x118   :  { %v164_v42 = vmax.f32 %v162_v41, 0.0 }
 0x11a   :  { %201 = vmatmul.f32.vlgmr.msra.gmra.mxu2 %v164_v42 }
 0x19d   :  { %v202_v44 = vpop.f32.mrf.mxu2 }
 0x19e   :  { %v203_v45 = vadd.f32 %v227_v43, %v202_v44 }
 0x1a0   :  { %228 = vtanh.f32 %v203_v45 }
 0x1a6   :  { %v229_v47 = vpop.eup %228 }
 0x1a7   :  { %v207_v48 = vmul.f32 %v229_v47, %v206_v46 }
 0x1a9   :  { %209 = vst.msk [vmem:[%s508_s8] sm:$0xff] %vm208_vm2, %v207_v48 }
 0x1aa   :  { %214 = vsyncpa [#allocation4], 1 }
 0x1ab   :  { %215 = vsyncpa [#allocation6], 1 }
 0x1ac   :  { %216 = vsyncpa [#allocation9], 1 }

</bundles_post_ra>
